<compile_context>
chip_gen: v7x
topology: tpu7x:2x2x1
jax: 0.10.0
libtpu: 0.0.40
codegen_flags: <defaults>
</compile_context>

<pallas_src>
from functools import partial

import numpy as np

import jax
import jax.numpy as jnp
from jax.experimental import pallas as pl
from jax.experimental.pallas import tpu as pltpu

# ---------------- RenovateNet hyper-parameters (torch defaults) ---------------
ALP = 0.125
TMP = 0.125
INV_TMP = 1.0 / TMP            # 8.0 (exact: tmp is a power of two)
MOM = 0.9
PRED_THRESHOLD = 0.0           # must stay 0.0 for the dropped tp-gate to be valid
BN_EPS = 1e-5

assert PRED_THRESHOLD == 0.0, "kernel drops the tp threshold gate; only valid at 0"


# =============================== Pallas kernel ================================
def _renovate_kernel(lbl_ref, logit_ref, feat_ref, w_ref, b_ref, avgf_ref,
                     loss_ref, new_avgf_ref):
    """Fused RenovateNet ('V0', return_loss=True) forward for ONE branch.

    Called with grid=(2,); the branch axis selects the stacked feature / weight
    / bias / memory-bank blocks, while labels and logits are shared.
    """
    lbl_col = lbl_ref[...]          # (B, 1) int32 ground-truth labels
    logit_raw = logit_ref[...]      # (B, K) pre-softmax logits (shared)
    feat_in = feat_ref[...]         # (B, C) squeezed features (this branch)
    W = w_ref[...]                  # (C, H) cl_fc weight (already transposed)
    bias = b_ref[...]               # (1, H)
    avg_f = avgf_ref[...]           # (H, K) class memory bank (this branch)

    B, K = logit_raw.shape

    # ---- one-hot label & argmax prediction, built in-kernel -------------------
    col_i = jax.lax.broadcasted_iota(jnp.int32, (B, K), 1)
    lbl_one = (col_i == lbl_col).astype(jnp.float32)                 # (B, K)
    col_f = col_i.astype(jnp.float32)
    row_max = jnp.max(logit_raw, axis=1, keepdims=True)
    # first-match tie-break, same as torch.max(1)[1]
    pred_idx = jnp.min(jnp.where(logit_raw == row_max, col_f, float(K)),
                       axis=1, keepdims=True)
    pred_one = (col_f == pred_idx).astype(jnp.float32)               # (B, K)

    # ---- cl_fc linear projection (MXU) ----------------------------------------
    feature = jnp.dot(feat_in, W, preferred_element_type=jnp.float32) + bias   # (B, H)

    # ---- softmax over classes (exact narrow reciprocal, broadcast multiply) ---
    ez = jnp.exp(logit_raw - row_max)
    logit = ez * (1.0 / jnp.sum(ez, axis=1, keepdims=True))                    # (B, K)

    # ---- tp / fn / fp masks (threshold gate dropped, see header) --------------
    tp = lbl_one * pred_one
    fn = lbl_one - tp               # >= 0 elementwise
    fp = pred_one - tp              # >= 0 elementwise
    mask = tp

    num_fn = jnp.sum(fn, axis=0, keepdims=True)          # (1, K)
    num_fp = jnp.sum(fp, axis=0, keepdims=True)          # (1, K)
    has_fn = (num_fn > 1e-8).astype(jnp.float32)
    has_fp = (num_fp > 1e-8).astype(jnp.float32)

    # L1 column normalization (fn / fp are non-negative -> |.|-sums == sums)
    fn_n = fn * (1.0 / jnp.maximum(num_fn, 1e-12))
    fp_n = fp * (1.0 / jnp.maximum(num_fp, 1e-12))

    # ---- class-prototype aggregation: contract axis 0 of feature directly -----
    # (no feature.T materialization; MXU consumes the stored layout)
    dn = (((0,), (0,)), ((), ()))
    f_fn = jax.lax.dot_general(feature, fn_n, dn,
                               preferred_element_type=jnp.float32)   # (H, K)
    f_fp = jax.lax.dot_general(feature, fp_n, dn,
                               preferred_element_type=jnp.float32)   # (H, K)
    f_mk = jax.lax.dot_general(feature, mask, dn,
                               preferred_element_type=jnp.float32)   # (H, K)

    mask_sum = jnp.sum(mask, axis=0, keepdims=True)       # (1, K)
    f_mask = f_mk * (1.0 / (mask_sum + 1e-12))
    has_object = jnp.where(mask_sum > 1e-8, MOM, 1.0)     # (1, K)
    f_mem = avg_f * has_object + (1.0 - has_object) * f_mask          # (H, K)
    new_avgf_ref[...] = f_mem       # stateful memory-bank update (aliased buffer)

    # ---- L2 normalization via EUP rsqrt ---------------------------------------
    # 1e-24 ~ (1e-12)^2 keeps exactly-zero rows/columns at zero, matching the
    # reference's /(norm + 1e-12) to ~ulp for non-degenerate vectors.
    feat_n = feature * jax.lax.rsqrt(
        jnp.sum(feature * feature, axis=1, keepdims=True) + 1e-24)    # (B, H)

    def _col_l2n(x_hk):             # normalize columns of (H, K) along H
        return x_hk * jax.lax.rsqrt(
            jnp.sum(x_hk * x_hk, axis=0, keepdims=True) + 1e-24)

    f_mem_n = _col_l2n(f_mem)
    f_fn_n = _col_l2n(f_fn)
    f_fp_n = _col_l2n(f_fp)

    # ---- similarity scores, kept in (B, K) orientation (no transposes) --------
    score_mem = jnp.dot(feat_n, f_mem_n, preferred_element_type=jnp.float32)   # (B, K)
    score_fn = jnp.dot(feat_n, f_fn_n, preferred_element_type=jnp.float32) - 1.0
    score_fp = -jnp.dot(feat_n, f_fp_n, preferred_element_type=jnp.float32) - 1.0

    p_map = (1.0 - logit) * lbl_one * ALP                 # (B, K)   use_p_map=True
    s_cl_fn = (score_mem + score_fn * p_map * has_fn) * INV_TMP       # (B, K)
    s_cl_fp = (score_mem + score_fp * p_map * has_fp) * INV_TMP       # (B, K)

    # ---- two cross-entropy losses (reduction='mean') ---------------------------
    def _ce(s):
        m = jnp.max(s, axis=1, keepdims=True)
        lse = jnp.log(jnp.sum(jnp.exp(s - m), axis=1, keepdims=True)) + m      # (B, 1)
        tgt = jnp.sum(s * lbl_one, axis=1, keepdims=True)                      # (B, 1)
        return jnp.mean(lse - tgt)

    total = _ce(s_cl_fn) + _ce(s_cl_fp)
    # lane-dense per-branch row (disjoint block per grid step -> parallel-safe)
    loss_ref[...] = jnp.full((1, 128), total, dtype=jnp.float32)


def renovate_net_fused(lbl_col, logit_raw, feat_stack, w_stack, b_stack, avg_stack):
    """Both RenovateNet branches in one pallas_call (grid over the branch axis).

    Returns (loss_blk (2,1,128), new_avg (2,H,K))."""
    B, K = logit_raw.shape
    _, _, Cmax = feat_stack.shape
    _, _, H = w_stack.shape

    return pl.pallas_call(
        _renovate_kernel,
        grid=(2,),
        in_specs=[
            pl.BlockSpec((B, 1), lambda b: (0, 0)),            # labels (shared)
            pl.BlockSpec((B, K), lambda b: (0, 0)),            # logits (shared)
            pl.BlockSpec((None, B, Cmax), lambda b: (b, 0, 0)),  # features
            pl.BlockSpec((None, Cmax, H), lambda b: (b, 0, 0)),  # cl_fc weight
            pl.BlockSpec((None, 1, H), lambda b: (b, 0, 0)),     # cl_fc bias
            pl.BlockSpec((None, H, K), lambda b: (b, 0, 0)),     # avg_f bank
        ],
        out_specs=(
            pl.BlockSpec((None, 1, 128), lambda b: (b, 0, 0)),   # per-branch loss
            pl.BlockSpec((None, H, K), lambda b: (b, 0, 0)),     # updated bank
        ),
        out_shape=(jax.ShapeDtypeStruct((2, 1, 128), jnp.float32),
                   jax.ShapeDtypeStruct((2, H, K), jnp.float32)),
        input_output_aliases={5: 1},   # stacked avg_f buffer reused for new bank
        compiler_params=pltpu.CompilerParams(
            dimension_semantics=("parallel",)),   # v7x: one branch per TensorCore
    )(lbl_col, logit_raw, feat_stack, w_stack, b_stack, avg_stack)


# ============================== JAX glue (ST wrapper) =========================
def _squeeze_bn_relu(x, w, b, gamma, beta, mean, var):
    """1x1 Conv2d + BatchNorm2d (inference) + ReLU.  x: (N, C, T, V), w: (O, C)."""
    y = jnp.einsum("nctv,oc->notv", x, w) + b[None, :, None, None]
    scale = gamma * jax.lax.rsqrt(var + BN_EPS)
    y = (y - mean[None, :, None, None]) * scale[None, :, None, None] \
        + beta[None, :, None, None]
    return jnp.maximum(y, 0.0)


@partial(jax.jit, static_argnames=("n_person",))
def st_renovate_net_forward(raw_feat, lbl, logit_raw, params, *, n_person):
    """ST_RenovateNet.forward (return_loss=True).  raw_feat: (N*M, C, T, V)."""
    NM, C, T, V = raw_feat.shape
    N = NM // n_person
    feat = raw_feat.reshape(N, n_person, C, T, V).mean(axis=1)     # (N, C, T, V)

    # spatio: mean over frames; tempor: mean over joints -> squeeze -> flatten
    sp_x = _squeeze_bn_relu(feat.mean(axis=2, keepdims=True),
                            *params["spatio_squeeze"]).reshape(N, -1)
    te_x = _squeeze_bn_relu(feat.mean(axis=3, keepdims=True),
                            *params["tempor_squeeze"]).reshape(N, -1)

    w_s, b_s, avg_s = params["spatio_cl"]
    w_t, b_t, avg_t = params["tempor_cl"]

    # Zero-pad the (possibly different) input-channel dims so both branches can
    # be stacked for the fused kernel (zero feature cols x zero W rows are exact).
    C_s, C_t = sp_x.shape[1], te_x.shape[1]
    Cmax = max(C_s, C_t)

    def _pad_cols(x, c):
        return x if c == Cmax else jnp.pad(x, ((0, 0), (0, Cmax - c)))

    def _pad_rows(w, c):
        return w if c == Cmax else jnp.pad(w, ((0, Cmax - c), (0, 0)))

    feat_stack = jnp.stack([_pad_cols(sp_x, C_s), _pad_cols(te_x, C_t)])   # (2,N,Cmax)
    w_stack = jnp.stack([_pad_rows(w_s, C_s), _pad_rows(w_t, C_t)])        # (2,Cmax,H)
    b_stack = jnp.stack([b_s, b_t])                                        # (2,1,H)
    avg_stack = jnp.stack([avg_s, avg_t])                                  # (2,H,K)

    lbl_col = lbl.astype(jnp.int32).reshape(N, 1)

    loss_blk, new_avg = renovate_net_fused(
        lbl_col, logit_raw, feat_stack, w_stack, b_stack, avg_stack)

    total_loss = loss_blk[0, 0, 0] + loss_blk[1, 0, 0]
    return total_loss, (new_avg[0], new_avg[1])


# ============================ pure-JAX reference ==============================
def _renovate_reference(feature_in, W, bias, lbl_one, pred_one, logit_raw, avg_f):
    feature = feature_in @ W + bias
    logit = jax.nn.softmax(logit_raw, axis=1)
    tp = lbl_one * pred_one
    fn = lbl_one - tp
    fp = pred_one - tp
    mask = tp * (logit > PRED_THRESHOLD).astype(jnp.float32)
    has_fn = (jnp.sum(fn, 0, keepdims=True) > 1e-8).astype(jnp.float32)
    has_fp = (jnp.sum(fp, 0, keepdims=True) > 1e-8).astype(jnp.float32)
    fT = feature.T
    fn_n = fn / jnp.maximum(jnp.sum(jnp.abs(fn), 0, keepdims=True), 1e-12)
    fp_n = fp / jnp.maximum(jnp.sum(jnp.abs(fp), 0, keepdims=True), 1e-12)
    f_fn = fT @ fn_n
    f_fp = fT @ fp_n
    mask_sum = jnp.sum(mask, 0, keepdims=True)
    f_mask = (fT @ mask) / (mask_sum + 1e-12)
    has_object = jnp.where(mask_sum > 1e-8, MOM, 1.0)
    f_mem = avg_f * has_object + (1 - has_object) * f_mask
    feat_n = feature / (jnp.linalg.norm(feature, axis=1, keepdims=True) + 1e-12)
    nrm = lambda x: x.T / (jnp.linalg.norm(x.T, axis=-1, keepdims=True) + 1e-12)
    f_mem_n, f_fn_n, f_fp_n = nrm(f_mem), nrm(f_fn), nrm(f_fp)
    p_map = (1 - logit) * lbl_one * ALP
    score_mem = f_mem_n @ feat_n.T
    score_fn = f_fn_n @ feat_n.T - 1
    score_fp = -(f_fp_n @ feat_n.T) - 1
    s_cl_fn = ((score_mem + score_fn * p_map.T * has_fn.T) / TMP).T
    s_cl_fp = ((score_mem + score_fp * p_map.T * has_fp.T) / TMP).T

    def ce(s):
        lse = jax.scipy.special.logsumexp(s, axis=1)
        tgt = jnp.sum(s * lbl_one, axis=1)
        return jnp.mean(lse - tgt)

    return ce(s_cl_fn) + ce(s_cl_fp), f_mem


def _st_reference(raw_feat, lbl, logit_raw, params, n_person):
    NM, C, T, V = raw_feat.shape
    N = NM // n_person
    feat = raw_feat.reshape(N, n_person, C, T, V).mean(axis=1)
    K = logit_raw.shape[1]
    pred_one = jax.nn.one_hot(jnp.argmax(logit_raw, axis=1), K, dtype=jnp.float32)
    lbl_one = jax.nn.one_hot(lbl, K, dtype=jnp.float32)

    sp_x = _squeeze_bn_relu(feat.mean(axis=2, keepdims=True),
                            *params["spatio_squeeze"]).reshape(N, -1)
    w_s, b_s, avg_s = params["spatio_cl"]
    sp_loss, sp_avg = _renovate_reference(sp_x, w_s, b_s, lbl_one, pred_one,
                                          logit_raw, avg_s)

    te_x = _squeeze_bn_relu(feat.mean(axis=3, keepdims=True),
                            *params["tempor_squeeze"]).reshape(N, -1)
    w_t, b_t, avg_t = params["tempor_cl"]
    te_loss, te_avg = _renovate_reference(te_x, w_t, b_t, lbl_one, pred_one,
                                          logit_raw, avg_t)
    return sp_loss + te_loss, (sp_avg, te_avg)


# ==================================== main ====================================
if __name__ == "__main__":
    # Small but structurally faithful ST-GCN style shapes.
    N, M, C, T, V = 8, 2, 8, 8, 8      # videos, persons, channels, frames, joints
    HC = 32                            # h_channel (divisible by n_frame, n_joint)
    K = 6                              # n_class
    O_V, O_T = HC // V, HC // T        # squeeze output channels

    key = jax.random.PRNGKey(0)
    ks = jax.random.split(key, 13)

    raw_feat = jax.random.normal(ks[0], (N * M, C, T, V), dtype=jnp.float32)
    lbl = jax.random.randint(ks[1], (N,), 0, K)
    logit_raw = jax.random.normal(ks[2], (N, K), dtype=jnp.float32)

    def bn_identity(o):    # eval-mode BatchNorm2d parameters at default init
        return (jnp.ones((o,), jnp.float32), jnp.zeros((o,), jnp.float32),
                jnp.zeros((o,), jnp.float32), jnp.ones((o,), jnp.float32))

    params = {
        "spatio_squeeze": (0.2 * jax.random.normal(ks[3], (O_V, C), jnp.float32),
                           0.05 * jax.random.normal(ks[4], (O_V,), jnp.float32),
                           *bn_identity(O_V)),
        "tempor_squeeze": (0.2 * jax.random.normal(ks[5], (O_T, C), jnp.float32),
                           0.05 * jax.random.normal(ks[6], (O_T,), jnp.float32),
                           *bn_identity(O_T)),
        "spatio_cl": (0.1 * jax.random.normal(ks[7], (HC, HC), jnp.float32),
                      0.01 * jax.random.normal(ks[8], (1, HC), jnp.float32),
                      jax.random.normal(ks[9], (HC, K), jnp.float32)),
        "tempor_cl": (0.1 * jax.random.normal(ks[10], (HC, HC), jnp.float32),
                      0.01 * jax.random.normal(ks[11], (1, HC), jnp.float32),
                      jax.random.normal(ks[12], (HC, K), jnp.float32)),
    }

    loss, (avg_s_new, avg_t_new) = st_renovate_net_forward(
        raw_feat, lbl, logit_raw, params, n_person=M)
    loss = jax.block_until_ready(loss)

    ref_loss, (ref_avg_s, ref_avg_t) = _st_reference(raw_feat, lbl, logit_raw,
                                                     params, M)
    np.testing.assert_allclose(np.asarray(loss), np.asarray(ref_loss),
                               rtol=1e-4, atol=1e-4)
    np.testing.assert_allclose(np.asarray(avg_s_new), np.asarray(ref_avg_s),
                               rtol=1e-4, atol=1e-4)
    np.testing.assert_allclose(np.asarray(avg_t_new), np.asarray(ref_avg_t),
                               rtol=1e-4, atol=1e-4)
    print("KERNEL_OK")
</pallas_src>

<mosaic_0001>
module attributes {stable_mosaic.version = 11 : i64} {
  func.func @_renovate_kernel(%arg0: i32, %arg1: memref<8x1xi32, #tpu.memory_space<vmem>>, %arg2: memref<8x6xf32, #tpu.memory_space<vmem>>, %arg3: memref<1x8x32xf32, #tpu.memory_space<vmem>>, %arg4: memref<1x32x32xf32, #tpu.memory_space<vmem>>, %arg5: memref<1x1x32xf32, #tpu.memory_space<vmem>>, %arg6: memref<1x32x6xf32, #tpu.memory_space<vmem>>, %arg7: memref<1x1x128xf32, #tpu.memory_space<vmem>>, %arg8: memref<1x32x6xf32, #tpu.memory_space<vmem>>) attributes {dimension_semantics = [#tpu.dimension_semantics<parallel>], iteration_bounds = array<i64: 2>, scalar_prefetch = 0 : i64, scratch_operands = 0 : i64, tpu.core_type = #tpu.core_type<tc>, window_params = [{pipeline_mode = #tpu.pipeline_mode<synchronous>, transform_indices = @transform_0, window_bounds = array<i64: 8, 1>}, {pipeline_mode = #tpu.pipeline_mode<synchronous>, transform_indices = @transform_1, window_bounds = array<i64: 8, 6>}, {transform_indices = @transform_2, window_bounds = array<i64: 1, 8, 32>}, {transform_indices = @transform_3, window_bounds = array<i64: 1, 32, 32>}, {transform_indices = @transform_4, window_bounds = array<i64: 1, 1, 32>}, {transform_indices = @transform_5, window_bounds = array<i64: 1, 32, 6>}, {transform_indices = @transform_6, window_bounds = array<i64: 1, 1, 128>}, {transform_indices = @transform_7, window_bounds = array<i64: 1, 32, 6>}]} {
    %c0 = arith.constant 0 : index
    %c0_0 = arith.constant 0 : index
    %0 = vector.load %arg1[%c0, %c0_0] : memref<8x1xi32, #tpu.memory_space<vmem>>, vector<8x1xi32>
    %c0_1 = arith.constant 0 : index
    %c0_2 = arith.constant 0 : index
    %1 = vector.load %arg2[%c0_1, %c0_2] : memref<8x6xf32, #tpu.memory_space<vmem>>, vector<8x6xf32>
    %c0_3 = arith.constant 0 : index
    %c0_4 = arith.constant 0 : index
    %c0_5 = arith.constant 0 : index
    %2 = vector.load %arg3[%c0_3, %c0_4, %c0_5] : memref<1x8x32xf32, #tpu.memory_space<vmem>>, vector<1x8x32xf32>
    %3 = vector.shape_cast %2 : vector<1x8x32xf32> to vector<8x32xf32>
    %c0_6 = arith.constant 0 : index
    %c0_7 = arith.constant 0 : index
    %c0_8 = arith.constant 0 : index
    %4 = vector.load %arg4[%c0_6, %c0_7, %c0_8] : memref<1x32x32xf32, #tpu.memory_space<vmem>>, vector<1x32x32xf32>
    %5 = vector.shape_cast %4 : vector<1x32x32xf32> to vector<32x32xf32>
    %c0_9 = arith.constant 0 : index
    %c0_10 = arith.constant 0 : index
    %c0_11 = arith.constant 0 : index
    %6 = vector.load %arg5[%c0_9, %c0_10, %c0_11] : memref<1x1x32xf32, #tpu.memory_space<vmem>>, vector<1x1x32xf32>
    %7 = vector.shape_cast %6 : vector<1x1x32xf32> to vector<1x32xf32>
    %c0_12 = arith.constant 0 : index
    %c0_13 = arith.constant 0 : index
    %c0_14 = arith.constant 0 : index
    %8 = vector.load %arg6[%c0_12, %c0_13, %c0_14] : memref<1x32x6xf32, #tpu.memory_space<vmem>>, vector<1x32x6xf32>
    %9 = vector.shape_cast %8 : vector<1x32x6xf32> to vector<32x6xf32>
    %10 = tpu.iota {dimensions = array<i32: 1>} : vector<8x6xi32>
    %11 = vector.broadcast %0 : vector<8x1xi32> to vector<8x6xi32>
    %12 = arith.cmpi eq, %10, %11 : vector<8x6xi32>
    %13 = arith.extui %12 : vector<8x6xi1> to vector<8x6xi32>
    %14 = arith.sitofp %13 : vector<8x6xi32> to vector<8x6xf32>
    %15 = arith.sitofp %10 : vector<8x6xi32> to vector<8x6xf32>
    %cst = arith.constant dense<0xFF800000> : vector<8xf32>
    %16 = vector.multi_reduction <maximumf>, %1, %cst [1] : vector<8x6xf32> to vector<8xf32>
    %17 = vector.shape_cast %16 : vector<8xf32> to vector<8x1xf32>
    %18 = vector.broadcast %17 : vector<8x1xf32> to vector<8x6xf32>
    %19 = arith.cmpf oeq, %1, %18 : vector<8x6xf32>
    %cst_15 = arith.constant 6.000000e+00 : f32
    %20 = vector.broadcast %cst_15 : f32 to vector<8x6xf32>
    %21 = arith.select %19, %15, %20 : vector<8x6xi1>, vector<8x6xf32>
    %cst_16 = arith.constant dense<0x7F800000> : vector<8xf32>
    %22 = vector.multi_reduction <minimumf>, %21, %cst_16 [1] : vector<8x6xf32> to vector<8xf32>
    %23 = vector.shape_cast %22 : vector<8xf32> to vector<8x1xf32>
    %24 = vector.broadcast %23 : vector<8x1xf32> to vector<8x6xf32>
    %25 = arith.cmpf oeq, %15, %24 : vector<8x6xf32>
    %26 = arith.extui %25 : vector<8x6xi1> to vector<8x6xi32>
    %27 = arith.sitofp %26 : vector<8x6xi32> to vector<8x6xf32>
    %cst_17 = arith.constant dense<0.000000e+00> : vector<8x32xf32>
    %28 = tpu.matmul %3, %5, %cst_17 {dimension_numbers = #tpu.dot_dimension_numbers<[1], [0], [0], [1], [0, 0, 1, 1], [], []>} : vector<8x32xf32>, vector<32x32xf32>, vector<8x32xf32> -> vector<8x32xf32>
    %29 = vector.broadcast %7 : vector<1x32xf32> to vector<8x32xf32>
    %30 = arith.addf %28, %29 : vector<8x32xf32>
    %31 = vector.broadcast %17 : vector<8x1xf32> to vector<8x6xf32>
    %32 = arith.subf %1, %31 : vector<8x6xf32>
    %33 = math.exp %32 : vector<8x6xf32>
    %cst_18 = arith.constant dense<0.000000e+00> : vector<8xf32>
    %34 = vector.multi_reduction <add>, %33, %cst_18 [1] : vector<8x6xf32> to vector<8xf32>
    %35 = vector.shape_cast %34 : vector<8xf32> to vector<8x1xf32>
    %cst_19 = arith.constant 1.000000e+00 : f32
    %36 = vector.broadcast %cst_19 : f32 to vector<8x1xf32>
    %37 = arith.divf %36, %35 : vector<8x1xf32>
    %38 = vector.broadcast %37 : vector<8x1xf32> to vector<8x6xf32>
    %39 = arith.mulf %33, %38 : vector<8x6xf32>
    %40 = arith.mulf %14, %27 : vector<8x6xf32>
    %41 = arith.subf %14, %40 : vector<8x6xf32>
    %42 = arith.subf %27, %40 : vector<8x6xf32>
    %cst_20 = arith.constant dense<0.000000e+00> : vector<6xf32>
    %43 = vector.multi_reduction <add>, %41, %cst_20 [0] : vector<8x6xf32> to vector<6xf32>
    %44 = vector.shape_cast %43 : vector<6xf32> to vector<1x6xf32>
    %cst_21 = arith.constant dense<0.000000e+00> : vector<6xf32>
    %45 = vector.multi_reduction <add>, %42, %cst_21 [0] : vector<8x6xf32> to vector<6xf32>
    %46 = vector.shape_cast %45 : vector<6xf32> to vector<1x6xf32>
    %cst_22 = arith.constant 9.99999993E-9 : f32
    %47 = vector.broadcast %cst_22 : f32 to vector<1x6xf32>
    %48 = arith.cmpf ogt, %44, %47 : vector<1x6xf32>
    %49 = arith.extui %48 : vector<1x6xi1> to vector<1x6xi32>
    %50 = arith.sitofp %49 : vector<1x6xi32> to vector<1x6xf32>
    %cst_23 = arith.constant 9.99999993E-9 : f32
    %51 = vector.broadcast %cst_23 : f32 to vector<1x6xf32>
    %52 = arith.cmpf ogt, %46, %51 : vector<1x6xf32>
    %53 = arith.extui %52 : vector<1x6xi1> to vector<1x6xi32>
    %54 = arith.sitofp %53 : vector<1x6xi32> to vector<1x6xf32>
    %cst_24 = arith.constant 9.99999996E-13 : f32
    %55 = vector.broadcast %cst_24 : f32 to vector<1x6xf32>
    %56 = arith.maximumf %44, %55 : vector<1x6xf32>
    %cst_25 = arith.constant 1.000000e+00 : f32
    %57 = vector.broadcast %cst_25 : f32 to vector<1x6xf32>
    %58 = arith.divf %57, %56 : vector<1x6xf32>
    %59 = vector.broadcast %58 : vector<1x6xf32> to vector<8x6xf32>
    %60 = arith.mulf %41, %59 : vector<8x6xf32>
    %cst_26 = arith.constant 9.99999996E-13 : f32
    %61 = vector.broadcast %cst_26 : f32 to vector<1x6xf32>
    %62 = arith.maximumf %46, %61 : vector<1x6xf32>
    %cst_27 = arith.constant 1.000000e+00 : f32
    %63 = vector.broadcast %cst_27 : f32 to vector<1x6xf32>
    %64 = arith.divf %63, %62 : vector<1x6xf32>
    %65 = vector.broadcast %64 : vector<1x6xf32> to vector<8x6xf32>
    %66 = arith.mulf %42, %65 : vector<8x6xf32>
    %cst_28 = arith.constant dense<0.000000e+00> : vector<32x6xf32>
    %67 = tpu.matmul %30, %60, %cst_28 {dimension_numbers = #tpu.dot_dimension_numbers<[0], [0], [1], [1], [0, 1, 1, 1], [], []>} : vector<8x32xf32>, vector<8x6xf32>, vector<32x6xf32> -> vector<32x6xf32>
    %cst_29 = arith.constant dense<0.000000e+00> : vector<32x6xf32>
    %68 = tpu.matmul %30, %66, %cst_29 {dimension_numbers = #tpu.dot_dimension_numbers<[0], [0], [1], [1], [0, 1, 1, 1], [], []>} : vector<8x32xf32>, vector<8x6xf32>, vector<32x6xf32> -> vector<32x6xf32>
    %cst_30 = arith.constant dense<0.000000e+00> : vector<32x6xf32>
    %69 = tpu.matmul %30, %40, %cst_30 {dimension_numbers = #tpu.dot_dimension_numbers<[0], [0], [1], [1], [0, 1, 1, 1], [], []>} : vector<8x32xf32>, vector<8x6xf32>, vector<32x6xf32> -> vector<32x6xf32>
    %cst_31 = arith.constant dense<0.000000e+00> : vector<6xf32>
    %70 = vector.multi_reduction <add>, %40, %cst_31 [0] : vector<8x6xf32> to vector<6xf32>
    %71 = vector.shape_cast %70 : vector<6xf32> to vector<1x6xf32>
    %cst_32 = arith.constant 9.99999996E-13 : f32
    %72 = vector.broadcast %cst_32 : f32 to vector<1x6xf32>
    %73 = arith.addf %71, %72 : vector<1x6xf32>
    %cst_33 = arith.constant 1.000000e+00 : f32
    %74 = vector.broadcast %cst_33 : f32 to vector<1x6xf32>
    %75 = arith.divf %74, %73 : vector<1x6xf32>
    %76 = vector.broadcast %75 : vector<1x6xf32> to vector<32x6xf32>
    %77 = arith.mulf %69, %76 : vector<32x6xf32>
    %cst_34 = arith.constant 9.99999993E-9 : f32
    %78 = vector.broadcast %cst_34 : f32 to vector<1x6xf32>
    %79 = arith.cmpf ogt, %71, %78 : vector<1x6xf32>
    %cst_35 = arith.constant 0.899999976 : f32
    %cst_36 = arith.constant 1.000000e+00 : f32
    %80 = vector.broadcast %cst_35 : f32 to vector<1x6xf32>
    %81 = vector.broadcast %cst_36 : f32 to vector<1x6xf32>
    %82 = arith.select %79, %80, %81 : vector<1x6xi1>, vector<1x6xf32>
    %83 = vector.broadcast %82 : vector<1x6xf32> to vector<32x6xf32>
    %84 = arith.mulf %9, %83 : vector<32x6xf32>
    %cst_37 = arith.constant 1.000000e+00 : f32
    %85 = vector.broadcast %cst_37 : f32 to vector<1x6xf32>
    %86 = arith.subf %85, %82 : vector<1x6xf32>
    %87 = vector.broadcast %86 : vector<1x6xf32> to vector<32x6xf32>
    %88 = arith.mulf %87, %77 : vector<32x6xf32>
    %89 = arith.addf %84, %88 : vector<32x6xf32>
    %c0_38 = arith.constant 0 : index
    %c0_39 = arith.constant 0 : index
    %c0_40 = arith.constant 0 : index
    %90 = vector.load %arg8[%c0_38, %c0_39, %c0_40] : memref<1x32x6xf32, #tpu.memory_space<vmem>>, vector<1x32x6xf32>
    %91 = vector.shape_cast %90 : vector<1x32x6xf32> to vector<32x6xf32>
    %92 = vector.shape_cast %89 : vector<32x6xf32> to vector<1x32x6xf32>
    tpu.vector_store %arg8[%c0_38, %c0_39, %c0_40], %92 {strides = array<i32>} : memref<1x32x6xf32, #tpu.memory_space<vmem>>, vector<1x32x6xf32>,
    %93 = arith.mulf %30, %30 : vector<8x32xf32>
    %cst_41 = arith.constant dense<0.000000e+00> : vector<8xf32>
    %94 = vector.multi_reduction <add>, %93, %cst_41 [1] : vector<8x32xf32> to vector<8xf32>
    %95 = vector.shape_cast %94 : vector<8xf32> to vector<8x1xf32>
    %cst_42 = arith.constant 1.000000e-24 : f32
    %96 = vector.broadcast %cst_42 : f32 to vector<8x1xf32>
    %97 = arith.addf %95, %96 : vector<8x1xf32>
    %98 = math.rsqrt %97 : vector<8x1xf32>
    %99 = vector.broadcast %98 : vector<8x1xf32> to vector<8x32xf32>
    %100 = arith.mulf %30, %99 : vector<8x32xf32>
    %101 = arith.mulf %89, %89 : vector<32x6xf32>
    %cst_43 = arith.constant dense<0.000000e+00> : vector<6xf32>
    %102 = vector.multi_reduction <add>, %101, %cst_43 [0] : vector<32x6xf32> to vector<6xf32>
    %103 = vector.shape_cast %102 : vector<6xf32> to vector<1x6xf32>
    %cst_44 = arith.constant 1.000000e-24 : f32
    %104 = vector.broadcast %cst_44 : f32 to vector<1x6xf32>
    %105 = arith.addf %103, %104 : vector<1x6xf32>
    %106 = math.rsqrt %105 : vector<1x6xf32>
    %107 = vector.broadcast %106 : vector<1x6xf32> to vector<32x6xf32>
    %108 = arith.mulf %89, %107 : vector<32x6xf32>
    %109 = arith.mulf %67, %67 : vector<32x6xf32>
    %cst_45 = arith.constant dense<0.000000e+00> : vector<6xf32>
    %110 = vector.multi_reduction <add>, %109, %cst_45 [0] : vector<32x6xf32> to vector<6xf32>
    %111 = vector.shape_cast %110 : vector<6xf32> to vector<1x6xf32>
    %cst_46 = arith.constant 1.000000e-24 : f32
    %112 = vector.broadcast %cst_46 : f32 to vector<1x6xf32>
    %113 = arith.addf %111, %112 : vector<1x6xf32>
    %114 = math.rsqrt %113 : vector<1x6xf32>
    %115 = vector.broadcast %114 : vector<1x6xf32> to vector<32x6xf32>
    %116 = arith.mulf %67, %115 : vector<32x6xf32>
    %117 = arith.mulf %68, %68 : vector<32x6xf32>
    %cst_47 = arith.constant dense<0.000000e+00> : vector<6xf32>
    %118 = vector.multi_reduction <add>, %117, %cst_47 [0] : vector<32x6xf32> to vector<6xf32>
    %119 = vector.shape_cast %118 : vector<6xf32> to vector<1x6xf32>
    %cst_48 = arith.constant 1.000000e-24 : f32
    %120 = vector.broadcast %cst_48 : f32 to vector<1x6xf32>
    %121 = arith.addf %119, %120 : vector<1x6xf32>
    %122 = math.rsqrt %121 : vector<1x6xf32>
    %123 = vector.broadcast %122 : vector<1x6xf32> to vector<32x6xf32>
    %124 = arith.mulf %68, %123 : vector<32x6xf32>
    %cst_49 = arith.constant dense<0.000000e+00> : vector<8x6xf32>
    %125 = tpu.matmul %100, %108, %cst_49 {dimension_numbers = #tpu.dot_dimension_numbers<[1], [0], [0], [1], [0, 0, 1, 1], [], []>} : vector<8x32xf32>, vector<32x6xf32>, vector<8x6xf32> -> vector<8x6xf32>
    %cst_50 = arith.constant dense<0.000000e+00> : vector<8x6xf32>
    %126 = tpu.matmul %100, %116, %cst_50 {dimension_numbers = #tpu.dot_dimension_numbers<[1], [0], [0], [1], [0, 0, 1, 1], [], []>} : vector<8x32xf32>, vector<32x6xf32>, vector<8x6xf32> -> vector<8x6xf32>
    %cst_51 = arith.constant 1.000000e+00 : f32
    %127 = vector.broadcast %cst_51 : f32 to vector<8x6xf32>
    %128 = arith.subf %126, %127 : vector<8x6xf32>
    %cst_52 = arith.constant dense<0.000000e+00> : vector<8x6xf32>
    %129 = tpu.matmul %100, %124, %cst_52 {dimension_numbers = #tpu.dot_dimension_numbers<[1], [0], [0], [1], [0, 0, 1, 1], [], []>} : vector<8x32xf32>, vector<32x6xf32>, vector<8x6xf32> -> vector<8x6xf32>
    %cst_53 = arith.constant 0.000000e+00 : f32
    %130 = vector.broadcast %cst_53 : f32 to vector<8x6xf32>
    %131 = arith.subf %130, %129 : vector<8x6xf32>
    %cst_54 = arith.constant 1.000000e+00 : f32
    %132 = vector.broadcast %cst_54 : f32 to vector<8x6xf32>
    %133 = arith.subf %131, %132 : vector<8x6xf32>
    %cst_55 = arith.constant 1.000000e+00 : f32
    %134 = vector.broadcast %cst_55 : f32 to vector<8x6xf32>
    %135 = arith.subf %134, %39 : vector<8x6xf32>
    %136 = arith.mulf %135, %14 : vector<8x6xf32>
    %cst_56 = arith.constant 1.250000e-01 : f32
    %137 = vector.broadcast %cst_56 : f32 to vector<8x6xf32>
    %138 = arith.mulf %136, %137 : vector<8x6xf32>
    %139 = arith.mulf %128, %138 : vector<8x6xf32>
    %140 = vector.broadcast %50 : vector<1x6xf32> to vector<8x6xf32>
    %141 = arith.mulf %139, %140 : vector<8x6xf32>
    %142 = arith.addf %125, %141 : vector<8x6xf32>
    %cst_57 = arith.constant 8.000000e+00 : f32
    %143 = vector.broadcast %cst_57 : f32 to vector<8x6xf32>
    %144 = arith.mulf %142, %143 : vector<8x6xf32>
    %145 = arith.mulf %133, %138 : vector<8x6xf32>
    %146 = vector.broadcast %54 : vector<1x6xf32> to vector<8x6xf32>
    %147 = arith.mulf %145, %146 : vector<8x6xf32>
    %148 = arith.addf %125, %147 : vector<8x6xf32>
    %cst_58 = arith.constant 8.000000e+00 : f32
    %149 = vector.broadcast %cst_58 : f32 to vector<8x6xf32>
    %150 = arith.mulf %148, %149 : vector<8x6xf32>
    %cst_59 = arith.constant dense<0xFF800000> : vector<8xf32>
    %151 = vector.multi_reduction <maximumf>, %144, %cst_59 [1] : vector<8x6xf32> to vector<8xf32>
    %152 = vector.shape_cast %151 : vector<8xf32> to vector<8x1xf32>
    %153 = vector.broadcast %152 : vector<8x1xf32> to vector<8x6xf32>
    %154 = arith.subf %144, %153 : vector<8x6xf32>
    %155 = math.exp %154 : vector<8x6xf32>
    %cst_60 = arith.constant dense<0.000000e+00> : vector<8xf32>
    %156 = vector.multi_reduction <add>, %155, %cst_60 [1] : vector<8x6xf32> to vector<8xf32>
    %157 = vector.shape_cast %156 : vector<8xf32> to vector<8x1xf32>
    %158 = math.log %157 : vector<8x1xf32>
    %159 = arith.addf %158, %152 : vector<8x1xf32>
    %160 = arith.mulf %144, %14 : vector<8x6xf32>
    %cst_61 = arith.constant dense<0.000000e+00> : vector<8xf32>
    %161 = vector.multi_reduction <add>, %160, %cst_61 [1] : vector<8x6xf32> to vector<8xf32>
    %162 = vector.shape_cast %161 : vector<8xf32> to vector<8x1xf32>
    %163 = arith.subf %159, %162 : vector<8x1xf32>
    %164 = vector.shape_cast %163 : vector<8x1xf32> to vector<1x8x1xf32>
    %cst_62 = arith.constant dense<0.000000e+00> : vector<1xf32>
    %165 = vector.multi_reduction <add>, %164, %cst_62 [1, 2] : vector<1x8x1xf32> to vector<1xf32>
    %166 = vector.shape_cast %165 : vector<1xf32> to vector<1x1x1xf32>
    %167 = vector.extract %166[0, 0, 0] : f32 from vector<1x1x1xf32>
    %cst_63 = arith.constant 8.000000e+00 : f32
    %168 = arith.divf %167, %cst_63 : f32
    %cst_64 = arith.constant dense<0xFF800000> : vector<8xf32>
    %169 = vector.multi_reduction <maximumf>, %150, %cst_64 [1] : vector<8x6xf32> to vector<8xf32>
    %170 = vector.shape_cast %169 : vector<8xf32> to vector<8x1xf32>
    %171 = vector.broadcast %170 : vector<8x1xf32> to vector<8x6xf32>
    %172 = arith.subf %150, %171 : vector<8x6xf32>
    %173 = math.exp %172 : vector<8x6xf32>
    %cst_65 = arith.constant dense<0.000000e+00> : vector<8xf32>
    %174 = vector.multi_reduction <add>, %173, %cst_65 [1] : vector<8x6xf32> to vector<8xf32>
    %175 = vector.shape_cast %174 : vector<8xf32> to vector<8x1xf32>
    %176 = math.log %175 : vector<8x1xf32>
    %177 = arith.addf %176, %170 : vector<8x1xf32>
    %178 = arith.mulf %150, %14 : vector<8x6xf32>
    %cst_66 = arith.constant dense<0.000000e+00> : vector<8xf32>
    %179 = vector.multi_reduction <add>, %178, %cst_66 [1] : vector<8x6xf32> to vector<8xf32>
    %180 = vector.shape_cast %179 : vector<8xf32> to vector<8x1xf32>
    %181 = arith.subf %177, %180 : vector<8x1xf32>
    %182 = vector.shape_cast %181 : vector<8x1xf32> to vector<1x8x1xf32>
    %cst_67 = arith.constant dense<0.000000e+00> : vector<1xf32>
    %183 = vector.multi_reduction <add>, %182, %cst_67 [1, 2] : vector<1x8x1xf32> to vector<1xf32>
    %184 = vector.shape_cast %183 : vector<1xf32> to vector<1x1x1xf32>
    %185 = vector.extract %184[0, 0, 0] : f32 from vector<1x1x1xf32>
    %cst_68 = arith.constant 8.000000e+00 : f32
    %186 = arith.divf %185, %cst_68 : f32
    %187 = arith.addf %168, %186 : f32
    %188 = vector.broadcast %187 : f32 to vector<1x128xf32>
    %c0_69 = arith.constant 0 : index
    %c0_70 = arith.constant 0 : index
    %c0_71 = arith.constant 0 : index
    %189 = vector.load %arg7[%c0_69, %c0_70, %c0_71] : memref<1x1x128xf32, #tpu.memory_space<vmem>>, vector<1x1x128xf32>
    %190 = vector.shape_cast %189 : vector<1x1x128xf32> to vector<1x128xf32>
    %191 = vector.shape_cast %188 : vector<1x128xf32> to vector<1x1x128xf32>
    tpu.vector_store %arg7[%c0_69, %c0_70, %c0_71], %191 {strides = array<i32>} : memref<1x1x128xf32, #tpu.memory_space<vmem>>, vector<1x1x128xf32>,
    return
  }
  func.func @transform_0(%arg0: i32) -> (i32, i32) {
    %c0_i32 = arith.constant 0 : i32
    %c0_i32_0 = arith.constant 0 : i32
    %c0_i32_1 = arith.constant 0 : i32
    return %c0_i32, %c0_i32_0 : i32, i32
  }
  func.func @transform_1(%arg0: i32) -> (i32, i32) {
    %c0_i32 = arith.constant 0 : i32
    %c0_i32_0 = arith.constant 0 : i32
    %c0_i32_1 = arith.constant 0 : i32
    return %c0_i32, %c0_i32_0 : i32, i32
  }
  func.func @transform_2(%arg0: i32) -> (i32, i32, i32) {
    %c0_i32 = arith.constant 0 : i32
    %c0_i32_0 = arith.constant 0 : i32
    %c0_i32_1 = arith.constant 0 : i32
    return %arg0, %c0_i32, %c0_i32_0 : i32, i32, i32
  }
  func.func @transform_3(%arg0: i32) -> (i32, i32, i32) {
    %c0_i32 = arith.constant 0 : i32
    %c0_i32_0 = arith.constant 0 : i32
    %c0_i32_1 = arith.constant 0 : i32
    return %arg0, %c0_i32, %c0_i32_0 : i32, i32, i32
  }
  func.func @transform_4(%arg0: i32) -> (i32, i32, i32) {
    %c0_i32 = arith.constant 0 : i32
    %c0_i32_0 = arith.constant 0 : i32
    %c0_i32_1 = arith.constant 0 : i32
    return %arg0, %c0_i32, %c0_i32_0 : i32, i32, i32
  }
  func.func @transform_5(%arg0: i32) -> (i32, i32, i32) {
    %c0_i32 = arith.constant 0 : i32
    %c0_i32_0 = arith.constant 0 : i32
    %c0_i32_1 = arith.constant 0 : i32
    return %arg0, %c0_i32, %c0_i32_0 : i32, i32, i32
  }
  func.func @transform_6(%arg0: i32) -> (i32, i32, i32) {
    %c0_i32 = arith.constant 0 : i32
    %c0_i32_0 = arith.constant 0 : i32
    %c0_i32_1 = arith.constant 0 : i32
    return %arg0, %c0_i32, %c0_i32_0 : i32, i32, i32
  }
  func.func @transform_7(%arg0: i32) -> (i32, i32, i32) {
    %c0_i32 = arith.constant 0 : i32
    %c0_i32_0 = arith.constant 0 : i32
    %c0_i32_1 = arith.constant 0 : i32
    return %arg0, %c0_i32, %c0_i32_0 : i32, i32, i32
  }
}

</mosaic_0001>

<bundles_post_ra>
// kernel: st_renovate_net_forward.1
= control target key start
LH: loop header
LB: loop body
LE: loop exit
PB: predicated region body
PF: predicated region fallthrough
CT: control target
= control target key end

     0   :  { %s1572_s24 = smov 0   ;;  %s1762_s0 = inlined_call_operand.vmem [shape: s32[8,1], index: 0, kind: input, shape index: {}]   ;;  %s1763_s1 = inlined_call_operand.vmem [shape: f32[8,6], index: 1, kind: input, shape index: {}]   ;;  %s1764_s2 = inlined_call_operand.vmem [shape: f32[2,8,32], index: 2, kind: input, shape index: {}]   ;;  %s1765_s3 = inlined_call_operand.vmem [shape: f32[2,32,32], index: 3, kind: input, shape index: {}]   ;;  %s1766_s4 = inlined_call_operand.vmem [shape: f32[2,1,32], index: 4, kind: input, shape index: {}]   ;;  %s1767_s5 = inlined_call_operand.vmem [shape: f32[2,32,6], index: 5, kind: input, shape index: {}, may-alias: {5,7}]   ;;  %s1768_s6 = inlined_call_operand.vmem [shape: f32[2,1,128], index: 6, kind: output, shape index: {0}]   ;;  %s1769_s7 = inlined_call_operand.vmem [shape: f32[2,32,6], index: 7, kind: output, shape index: {1}, may-alias: {5,7}]  }
   0x1 LB: > { %s1305_s25 = sadd.s32 4294967295, %s1525_s24   ;;  %p1309_p0 = scmp.ge.s32.totalorder %s1525_s24, 1  ;;  %s1525_s24 = sphi %s1572_s24, %s18_s24  }
   0x2   : > { %p267_p1 = scmp.lt.s32.totalorder %s1525_s24, 3 }
   0x4   : > { %p268_p2 = pnand %p1309_p0, %p267_p1 }
   0x5   : > { %v340_v0 = vld [vmem:[%s1763_s1] sm:$0xff] (!%p268_p2)  ;;  %vm360_vm0 = vcmask (!%p268_p2), 48128   ;;  %p314_p3 = scmp.lt.s32.totalorder (!%p268_p2), %s1305_s25, 1  ;;  %v1527_v2 = vmov (!%p268_p2), 0.0|0.0   ;;  %vm1528_vm1 = vmmov (!%p268_p2), 0   ;;  %v1529_v3 = vmov (!%p268_p2), 0.0  }
   0x6   : > { %271 = sbr.rel (%p268_p2) target bundleno = 1404 (0x57c), region = 44  ;;  %v361_v1 = vsel (!%p268_p2), %vm360_vm0, %v340_v0, -inf  ;;  %1448 = vmatprep.subr.bf16.mxu0 (!%p268_p2), %v1527_v2  ;;  %1388 = vmatprep.mubr.msk.f32.mxu0 (!%p268_p2), %vm1528_vm1, %v1529_v3  ;;  %vm378_vm2 = vcmask (!%p268_p2), 261120   ;;  %v339_v11 = vld [vmem:[%s1762_s0] sm:$0xff] (!%p268_p2)  ;;  %v1530_v12 = vmov (!%p268_p2), 0   ;;  %v351_v13 = vlaneseq (!%p268_p2) }
   0x7   : > { %362 = vmax.xlane.f32.xlu0 (!%p268_p2), %v361_v1  ;;  %1491 = vset.pattern.permute.xlu1 (!%p268_p2), %v1530_v12  ;;  %vm524_vm6 = vcmask (!%p268_p2), 64512   ;;  %vm1145_vm10 = vcmask (!%p268_p2), 7168  }
   0x8   : > { %1492 = vset.pattern.permute.xlu0 (!%p268_p2), %v1530_v12  ;;  %354 = vperm.xlu1 (!%p268_p2), %1491, %v339_v11   ;;  %v352_v14 = vand.u32 (!%p268_p2), 127, %v351_v13 }
   0xa   : > { %v359_v15 = vcvt.s32.f32 (!%p268_p2), %v352_v14 }
   0xd   : > { %s1771_s25 = smov (!%p314_p3, %s1305_s25), 1 }
   0xe   : > { %s1590_s28 = sshll.u32 %s1771_s25, 5  ;;  %s1310_s9 = sshll.u32 %s1771_s25, 3 }
   0xf   : > { %s322_s8 = scalar_lea.vmem %s1765_s3, %s1590_s28  ;;  %s317_s12 = scalar_lea.vmem %s1764_s2, %s1310_s9 }
  0x10   : > { %v342_v4 = vld [vmem:[%s322_s8] sm:$0xff]  ;;  %v343_v5 = vld [vmem:[%s322_s8 + $0x8] sm:$0xff]  ;;  %v344_v6 = vld [vmem:[%s322_s8 + $0x10] sm:$0xff]  ;;  %s325_s17 = scalar_lea.vmem %s1766_s4, %s1771_s25  ;;  %s330_s20 = scalar_lea.vmem %s1767_s5, %s1590_s28 }
  0x11   : > { %v1449_v7 = vpack.c.bf16 %v343_v5, %v342_v4  ;;  %v345_v8 = vld [vmem:[%s322_s8 + $0x18] sm:$0xff]  ;;  %v341_v10 = vld [vmem:[%s317_s12] sm:$0xff]  ;;  %s1671_s23 = scalar_lea.vmem %s1769_s7, %s1590_s28  ;;  %s333_s9 = scalar_lea.vmem %s1768_s6, %s1771_s25 }
  0x12   : > { %v1452_v9 = vpack.c.bf16 %v345_v8, %v344_v6  ;;  %v1319_v21 = vld [vmem:[%s325_s17] ss:$0 sm:$0xff] }
  0x13   : > { %1450 = vmatpush3.bf16.msra.mxu0 %v1449_v7 }
  0x14   : > { %1451 = vmatprep.subr.bf16.mxu0 %v1527_v2 }
  0x17   : > { %1453 = vmatpush3.bf16.msra.mxu0 %v1452_v9 }
  0x1a   : > { %1389 = vmatmul.mubr.msk.f32.vlgmr.msra.gmra.mrb[0].mxu0 %vm378_vm2, %v341_v10  ;;  %v1531_v10 = vmov 1.0  }
  0x87   : > { %v355_v29 = vpop.permute.xlu1 %354 }
  0x88   : > { %vm356_vm4 = vcmp.eq.s32.totalorder %v352_v14, %v355_v29 }
  0x89   : > { %v1621_v31 = vsel %vm356_vm4, 1.0, %v1529_v3 }
  0x94   : > { %v363_v16 = vpop.xlane.xlu0 %362 }
  0x95   : > { %vm364_vm3 = vcmp.eq.f32.partialorder %v340_v0, %v363_v16  ;;  %v452_v19 = vsub.f32 %v340_v0, %v363_v16 }
  0x96   : > { %v365_v17 = vsel %vm364_vm3, %v359_v15, 6.0 }
  0x97   : > { %v366_v18 = vsel %vm360_vm0, %v365_v17, inf  ;;  %v453_v20 = vmul.f32 1.442695, %v452_v19 }
  0x98   : > { %367 = vmin.xlane.f32.xlu0 %v366_v18 }
  0x99   : > { %1493 = vpow2.f32 %v453_v20  ;;  %v347_v20 = vld [vmem:[%s330_s20] sm:$0xff] }
  0xa3   : > { %v1616_v27 = vpop.eup %1493 }
  0xa4   : > { %v455_v28 = vsel %vm360_vm0, %v1616_v27, 0.0 }
  0xed   : > { %v448_v22 = vpop.f32.mrb[0].mxu0 }
  0xee   : > { %v1610_v23 = vadd.f32 %v1319_v21, %v448_v22  ;;  %v1390_v24 = vpop.f32.mrb[1].mxu0 }
  0xf0   : > { %492 = vxpose.xlu1.b32.start.end [1/1] (short) (narrow) %v1610_v23, 32  ;;  %v825_v25 = vmul.f32 %v1610_v23, %v1610_v23 }
  0xf2   : > { %v826_v26 = vsel %vm378_vm2, %v825_v25, 0.0 }
  0xf3   : > { %827 = vadd.xlane.f32.xlu0 %v826_v26 }
  0xf7   : > { %456 = vadd.xlane.f32.xlu0 %v455_v28 }
 0x125   : > { %v368_v30 = vpop.xlane.xlu0 %367 }
 0x126   : > { %vm369_vm5 = vcmp.eq.f32.partialorder %v359_v15, %v368_v30  ;;  %v348_v15 = vld [vmem:[%s330_s20 + $0x8] sm:$0xff]  ;;  %v350_v30 = vld [vmem:[%s330_s20 + $0x18] sm:$0xff] }
 0x127   : > { %v1318_v32 = vsel %vm369_vm5, 1.0, %v1529_v3 }
 0x128   : > { %v461_v33 = vmul.f32 %v1318_v32, %v1621_v31 }
 0x12a   : > { %v462_v34 = vsub.f32 %v1621_v31, %v461_v33  ;;  %v463_v35 = vsub.f32 %v1318_v32, %v461_v33  ;;  %v792_v60 = vsel %vm360_vm0, %v461_v33, 0.0 }
 0x12b   : > { %v793_v61 = vrot.slane %v792_v60, 4 }
 0x12c   : > { %v464_v36 = vsel %vm360_vm0, %v462_v34, 0.0  ;;  %v471_v37 = vsel %vm360_vm0, %v463_v35, 0.0 }
 0x12d   : > { %v465_v38 = vrot.slane %v464_v36, 4  ;;  %v472_v39 = vrot.slane %v471_v37, 4  ;;  %v794_v62 = vadd.f32 %v793_v61, %v792_v60 }
 0x12f   : > { %v466_v40 = vadd.f32 %v465_v38, %v464_v36  ;;  %v473_v41 = vadd.f32 %v472_v39, %v471_v37  ;;  %v795_v63 = vrot.slane %v794_v62, 2  ;;  %v349_v36 = vld [vmem:[%s330_s20 + $0x10] sm:$0xff] }
 0x131   : > { %v467_v42 = vrot.slane %v466_v40, 2  ;;  %v474_v43 = vrot.slane %v473_v41, 2  ;;  %v796_v0 = vadd.f32 %v795_v63, %v794_v62 }
 0x133   : > { %v468_v44 = vadd.f32 %v467_v42, %v466_v40  ;;  %v475_v45 = vadd.f32 %v474_v43, %v473_v41  ;;  %v797_v1 = vrot.slane %v796_v0, 1 }
 0x135   : > { %v469_v46 = vrot.slane %v468_v44, 1  ;;  %v476_v47 = vrot.slane %v475_v45, 1  ;;  %v798_v4 = vadd.f32 %v797_v1, %v796_v0 }
 0x137   : > { %v1628_v48 = vadd.f32 %v469_v46, %v468_v44  ;;  %v1630_v49 = vadd.f32 %v476_v47, %v475_v45  ;;  %v799_v5 = vadd.f32 1e-12, %v798_v4  ;;  %vm806_vm7 = vcmp.gt.f32.partialorder %v798_v4, 1e-08 }
 0x138   : > { %v807_v11 = vsel %vm806_vm7, 0.9, %v1531_v10 }
 0x139   : > { %v484_v50 = vmax.f32 %v1628_v48, 1e-12  ;;  %v488_v51 = vmax.f32 %v1630_v49, 1e-12  ;;  %v812_v19 = vsub.f32 1.0, %v807_v11  ;;  %v809_v24 = vmul.f32 %v807_v11, %v348_v15 }
 0x13a   : > { %v808_v26 = vmul.f32 %v807_v11, %v347_v20  ;;  %v811_v43 = vmul.f32 %v807_v11, %v350_v30  ;;  %v810_v47 = vmul.f32 %v807_v11, %v349_v36  ;;  %vm478_vm8 = vcmp.gt.f32.partialorder %v1628_v48, 1e-08 }
 0x13b   : > { %1495 = vrcp.f32 %v484_v50  ;;  %vm481_vm9 = vcmp.gt.f32.partialorder %v1630_v49, 1e-08 }
 0x13c   : > { %1497 = vrcp.f32 %v488_v51  ;;  %v1322_v48 = vsel %vm481_vm9, 1.0, %v1529_v3 }
 0x13d   : > { %1499 = vrcp.f32 %v799_v5 }
 0x145   : > { %v1496_v52 = vpop.eup %1495 }
 0x146   : > { %v1498_v53 = vpop.eup %1497  ;;  %v487_v54 = vmul.f32 %v1496_v52, %v462_v34 }
 0x147   : > { %v491_v55 = vmul.f32 %v1498_v53, %v463_v35  ;;  %v1500_v13 = vpop.eup %1499 }
 0x148   : > { %1391 = vmatprep.subr.mxu0 %v487_v54  ;;  %1472 = vmatprep.subr.mxu1 %v487_v54 }
 0x149   : > { %1392 = vmatpush3.msra.mxu0 %v487_v54  ;;  %1473 = vmatpush3.msra.mxu1 %v487_v54 }
 0x14a   : > { %1399 = vmatprep.subr.mxu1 %v491_v55  ;;  %1407 = vmatprep.subr.mxu0 %v461_v33 }
 0x170   : > { %v508_v56 = vpop.trf.xlu1 }
 0x171   : > { %1393 = vmatprep.mubr.msk.f32.mxu0 %vm524_vm6, %v508_v56 }
 0x174   : > { %v509_v57 = vpop.trf.xlu1 }
 0x175   : > { %1394 = vmatmul.mubr.msk.f32.vlgmr.msra.gmra.mrb[2].mxu0 %vm524_vm6, %v509_v57 }
 0x176   : > { %1408 = vmatpush3.msra.mxu0 %v461_v33  ;;  %1409 = vmatprep.mubr.msk.f32.mxu0 %vm524_vm6, %v508_v56 }
 0x177   : > { %1460 = vmatprep.subr.bf16.mxu0 %v1527_v2 }
 0x178   : > { %v510_v58 = vpop.trf.xlu1 }
 0x179   : > { %1396 = vmatprep.mubr.msk.f32.mxu1 %vm524_vm6, %v510_v58  ;;  %1410 = vmatmul.mubr.msk.f32.vlgmr.msra.gmra.mrb[4].mxu0 %vm524_vm6, %v509_v57 }
 0x17a   : > { %1412 = vmatprep.mubr.msk.f32.mxu0 %vm524_vm6, %v510_v58 }
 0x17c   : > { %v511_v59 = vpop.trf.xlu1 }
 0x17d   : > { %1397 = vmatmul.mubr.msk.f32.vlgmr.msra.gmra.mrb[0].mxu1 %vm524_vm6, %v511_v59  ;;  %1413 = vmatmul.mubr.msk.f32.gmra.mrb[6].mxu0 %vm524_vm6, %v511_v59 }
 0x17e   : > { %1400 = vmatpush3.msra.mxu1 %v491_v55  ;;  %1401 = vmatprep.mubr.msk.f32.mxu1 %vm524_vm6, %v508_v56 }
 0x17f   : > { %1454 = vmatprep.subr.bf16.mxu1 %v1527_v2  ;;  %1434 = vmatprep.mubr.msk.f32.mxu0 %vm1528_vm1, %v1529_v3 }
 0x181   : > { %1402 = vmatmul.mubr.msk.f32.vlgmr.msra.gmra.mrb[2].mxu1 %vm524_vm6, %v509_v57 }
 0x182   : > { %1404 = vmatprep.mubr.msk.f32.mxu1 %vm524_vm6, %v510_v58 }
 0x185   : > { %1405 = vmatmul.mubr.msk.f32.gmra.mrb[4].mxu1 %vm524_vm6, %v511_v59 }
 0x186   : > { %1423 = vmatprep.mubr.msk.f32.mxu1 %vm1528_vm1, %v1529_v3 }
 0x248   : > { %v1653_v6 = vpop.f32.mrb[2].mxu0 }
 0x249   : > { %v856_v7 = vmul.f32 %v1653_v6, %v1653_v6  ;;  %v1661_v8 = vpop.f32.mrb[3].mxu0 }
 0x24a   : > { %v855_v9 = vmul.f32 %v1661_v8, %v1661_v8 }
 0x24b   : > { %v860_v12 = vsel %vm360_vm0, %v856_v7, 0.0 }
 0x24c   : > { %v859_v14 = vsel %vm360_vm0, %v855_v9, 0.0  ;;  %v1411_v16 = vpop.f32.mrb[4].mxu0 }
 0x24d   : > { %v861_v17 = vadd.f32 %v860_v12, %v859_v14  ;;  %v803_v18 = vmul.f32 %v1500_v13, %v1411_v16  ;;  %v773_v21 = vpop.f32.mrb[5].mxu0 }
 0x24e   : > { %v802_v22 = vmul.f32 %v1500_v13, %v773_v21 }
 0x24f   : > { %v814_v25 = vmul.f32 %v812_v19, %v803_v18 }
 0x250   : > { %v813_v28 = vmul.f32 %v812_v19, %v802_v22  ;;  %v1673_v29 = vpop.f32.mrb[0].mxu1  ;;  %v1414_v32 = vpop.f32.mrb[6].mxu0 }
 0x251   : > { %v1675_v33 = vadd.f32 %v814_v25, %v809_v24  ;;  %v805_v34 = vmul.f32 %v1500_v13, %v1414_v32  ;;  %v1677_v35 = vpop.f32.mrb[1].mxu1  ;;  %v783_v37 = vpop.f32.mrb[7].mxu0  ;;  %v858_v39 = vmul.f32 %v1673_v29, %v1673_v29 }
 0x252   : > { %v1679_v38 = vadd.f32 %v813_v28, %v808_v26  ;;  %v857_v40 = vmul.f32 %v1677_v35, %v1677_v35  ;;  %v804_v41 = vmul.f32 %v1500_v13, %v783_v37 }
 0x253   : > { %v833_v42 = vmul.f32 %v1675_v33, %v1675_v33  ;;  %v816_v44 = vmul.f32 %v812_v19, %v805_v34  ;;  %822 = vst.msk [vmem:[%s1671_s23 + $0x8] sm:$0xff] %vm360_vm0, %v1675_v33  ;;  %v864_v58 = vsel %vm360_vm0, %v858_v39, 0.0 }
 0x254   : > { %v832_v45 = vmul.f32 %v1679_v38, %v1679_v38  ;;  %v862_v46 = vsel %vm360_vm0, %v857_v40, 0.0  ;;  %v815_v50 = vmul.f32 %v812_v19, %v804_v41  ;;  %821 = vst.msk [vmem:[%s1671_s23] sm:$0xff] %vm360_vm0, %v1679_v38  ;;  %v1696_v51 = vpop.f32.mrb[2].mxu1  ;;  %v828_v41 = vpop.xlane.xlu0 %827 }
 0x255   : > { %v837_v52 = vsel %vm360_vm0, %v833_v42, 0.0  ;;  %v1699_v53 = vadd.f32 %v816_v44, %v811_v43  ;;  %v863_v54 = vadd.f32 %v862_v46, %v861_v17  ;;  %v879_v55 = vmul.f32 %v1696_v51, %v1696_v51  ;;  %v1703_v56 = vpop.f32.mrb[3].mxu1 }
 0x256   : > { %v836_v57 = vsel %vm360_vm0, %v832_v45, 0.0  ;;  %v819_v59 = vadd.f32 %v815_v50, %v810_v47  ;;  %v878_v60 = vmul.f32 %v1703_v56, %v1703_v56  ;;  %v829_v46 = vadd.f32 1e-24, %v828_v41 }
 0x257   : > { %v838_v61 = vadd.f32 %v837_v52, %v836_v57  ;;  %v865_v62 = vadd.f32 %v864_v58, %v863_v54  ;;  %824 = vst.msk [vmem:[%s1671_s23 + $0x18] sm:$0xff] %vm360_vm0, %v1699_v53  ;;  %v883_v63 = vsel %vm360_vm0, %v879_v55, 0.0  ;;  %v835_v0 = vmul.f32 %v1699_v53, %v1699_v53 }
 0x258   : > { %823 = vst.msk [vmem:[%s1671_s23 + $0x10] sm:$0xff] %vm360_vm0, %v819_v59  ;;  %v834_v1 = vmul.f32 %v819_v59, %v819_v59  ;;  %v882_v4 = vsel %vm360_vm0, %v878_v60, 0.0  ;;  %v1406_v5 = vpop.f32.mrb[4].mxu1 }
 0x259   : > { %v866_v7 = vrot.slane %v865_v62, 4  ;;  %v884_v9 = vadd.f32 %v883_v63, %v882_v4  ;;  %v698_v10 = vpop.f32.mrb[5].mxu1  ;;  %v881_v12 = vmul.f32 %v1406_v5, %v1406_v5  ;;  %v841_v16 = vsel %vm360_vm0, %v835_v0, 0.0 }
 0x25a   : > { %v839_v11 = vsel %vm360_vm0, %v834_v1, 0.0  ;;  %v880_v13 = vmul.f32 %v698_v10, %v698_v10 }
 0x25b   : > { %v867_v14 = vadd.f32 %v866_v7, %v865_v62  ;;  %v840_v15 = vadd.f32 %v839_v11, %v838_v61  ;;  %v887_v21 = vsel %vm360_vm0, %v881_v12, 0.0 }
 0x25c   : > { %v885_v17 = vsel %vm360_vm0, %v880_v13, 0.0 }
 0x25d   : > { %v868_v18 = vrot.slane %v867_v14, 2  ;;  %v842_v19 = vadd.f32 %v841_v16, %v840_v15  ;;  %v886_v20 = vadd.f32 %v885_v17, %v884_v9 }
 0x25f   : > { %v869_v22 = vadd.f32 %v868_v18, %v867_v14  ;;  %v843_v24 = vrot.slane %v842_v19, 4  ;;  %v888_v25 = vadd.f32 %v887_v21, %v886_v20 }
 0x261   : > { %v870_v26 = vrot.slane %v869_v22, 1  ;;  %v844_v28 = vadd.f32 %v843_v24, %v842_v19  ;;  %v889_v30 = vrot.slane %v888_v25, 4 }
 0x263   : > { %v871_v32 = vadd.f32 %v870_v26, %v869_v22  ;;  %v845_v34 = vrot.slane %v844_v28, 2  ;;  %v890_v36 = vadd.f32 %v889_v30, %v888_v25 }
 0x265   : > { %v872_v37 = vadd.f32 1e-24, %v871_v32  ;;  %v846_v39 = vadd.f32 %v845_v34, %v844_v28  ;;  %v891_v40 = vrot.slane %v890_v36, 2 }
 0x267   : > { %1501 = vrsqrt.f32 %v872_v37  ;;  %v847_v42 = vrot.slane %v846_v39, 1  ;;  %v892_v43 = vadd.f32 %v891_v40, %v890_v36 }
 0x269   : > { %v848_v44 = vadd.f32 %v847_v42, %v846_v39  ;;  %v893_v45 = vrot.slane %v892_v43, 1 }
 0x26b   : > { %v849_v47 = vadd.f32 1e-24, %v848_v44  ;;  %v894_v50 = vadd.f32 %v893_v45, %v892_v43 }
 0x26d   : > { %1503 = vrsqrt.f32 %v849_v47  ;;  %v895_v52 = vadd.f32 1e-24, %v894_v50 }
 0x26e   : > { %1505 = vrsqrt.f32 %v829_v46 }
 0x26f   : > { %1507 = vrsqrt.f32 %v895_v52 }
 0x271   : > { %v1502_v54 = vpop.eup %1501 }
 0x272   : > { %v876_v55 = vmul.f32 %v1502_v54, %v1677_v35  ;;  %v877_v57 = vmul.f32 %v1502_v54, %v1673_v29  ;;  %v874_v58 = vmul.f32 %v1502_v54, %v1661_v8  ;;  %v875_v60 = vmul.f32 %v1502_v54, %v1653_v6 }
 0x274   : > { %v1464_v61 = vpack.c.bf16 %v877_v57, %v876_v55  ;;  %v1461_v62 = vpack.c.bf16 %v875_v60, %v874_v58 }
 0x276   : > { %1462 = vmatpush3.bf16.msra.mxu0 %v1461_v62 }
 0x277   : > { %v1504_v63 = vpop.eup %1503  ;;  %1463 = vmatprep.subr.bf16.mxu0 %v1527_v2 }
 0x278   : > { %v1506_v0 = vpop.eup %1505  ;;  %v853_v1 = vmul.f32 %v1504_v63, %v819_v59  ;;  %v851_v4 = vmul.f32 %v1504_v63, %v1679_v38  ;;  %v852_v7 = vmul.f32 %v1504_v63, %v1675_v33  ;;  %v854_v35 = vmul.f32 %v1504_v63, %v1699_v53 }
 0x279   : > { %v1508_v9 = vpop.eup %1507  ;;  %v831_v12 = vmul.f32 %v1506_v0, %v1610_v23  ;;  %v457_v23 = vpop.xlane.xlu0 %456 }
 0x27a   : > { %v899_v29 = vmul.f32 %v1508_v9, %v698_v10  ;;  %v900_v11 = vmul.f32 %v1508_v9, %v1406_v5  ;;  %1465 = vmatpush3.bf16.msra.mxu0 %v1464_v61  ;;  %v1455_v8 = vpack.c.bf16 %v852_v7, %v851_v4  ;;  %v1458_v6 = vpack.c.bf16 %v854_v35, %v853_v1 }
 0x27b   : > { %v897_v13 = vmul.f32 %v1508_v9, %v1703_v56  ;;  %v898_v14 = vmul.f32 %v1508_v9, %v1696_v51  ;;  %1509 = vrcp.f32 %v457_v23 }
 0x27c   : > { %v1470_v15 = vpack.c.bf16 %v900_v11, %v899_v29  ;;  %1456 = vmatpush3.bf16.msra.mxu1 %v1455_v8 }
 0x27d   : > { %1435 = vmatmul.mubr.msk.f32.vlgmr.msra.gmra.mrb[8].mxu0 %vm378_vm2, %v831_v12  ;;  %1457 = vmatprep.subr.bf16.mxu1 %v1527_v2  ;;  %v1467_v33 = vpack.c.bf16 %v898_v14, %v897_v13 }
 0x280   : > { %1459 = vmatpush3.bf16.msra.mxu1 %v1458_v6 }
 0x281   : > { %1466 = vmatprep.subr.bf16.mxu1 %v1527_v2 }
 0x283   : > { %1424 = vmatmul.mubr.msk.f32.vlgmr.msra.gmra.mrb[6].mxu1 %vm378_vm2, %v831_v12 }
 0x284   : > { %1468 = vmatpush3.bf16.msra.mxu1 %v1467_v33  ;;  %1445 = vmatprep.mubr.msk.f32.mxu1 %vm1528_vm1, %v1529_v3 }
 0x285   : > { %1469 = vmatprep.subr.bf16.mxu1 %v1527_v2  ;;  %v1510_v38 = vpop.eup %1509  ;;  %v1321_v2 = vsel %vm478_vm8, 1.0, %v1529_v3 }
 0x286   : > { %v460_v51 = vmul.f32 %v1510_v38, %v1616_v27 }
 0x288   : > { %1471 = vmatpush3.bf16.msra.mxu1 %v1470_v15  ;;  %v1117_v53 = vsub.f32 1.0, %v460_v51 }
 0x28a   : > { %v1118_v56 = vmul.f32 %v1621_v31, %v1117_v53 }
 0x28b   : > { %1446 = vmatmul.mubr.msk.f32.vlgmr.msra.gmra.mrb[8].mxu1 %vm378_vm2, %v831_v12 }
 0x28c   : > { %v1119_v10 = vmul.f32 0.125, %v1118_v56 }
 0x350   : > { %v1040_v59 = vpop.f32.mrb[8].mxu0 }
 0x351   : > { %v1337_v5 = vadd.f32 -1.0, %v1040_v59  ;;  %v1436_v16 = vpop.f32.mrb[9].mxu0 }
 0x353   : > { %v1120_v17 = vmul.f32 %v1337_v5, %v1119_v10 }
 0x355   : > { %v1121_v18 = vmul.f32 %v1321_v2, %v1120_v17 }
 0x356   : > { %v970_v19 = vpop.f32.mrb[6].mxu1 }
 0x357   : > { %v1122_v20 = vadd.f32 %v1121_v18, %v970_v19  ;;  %v1425_v21 = vpop.f32.mrb[7].mxu1 }
 0x359   : > { %v1123_v22 = vmul.f32 8.0, %v1122_v20 }
 0x35b   : > { %v1128_v24 = vsel %vm360_vm0, %v1123_v22, -inf  ;;  %v1140_v47 = vmul.f32 %v1621_v31, %v1123_v22 }
 0x35c   : > { %1129 = vmax.xlane.f32.xlu0 %v1128_v24 }
 0x35d   : > { %v1141_v50 = vsel %vm360_vm0, %v1140_v47, 0.0 }
 0x35e   : > { %v1111_v27 = vpop.f32.mrb[8].mxu1 }
 0x35f   : > { %v1115_v25 = vsub.f32 0.0, %v1111_v27  ;;  %v1447_v26 = vpop.f32.mrb[9].mxu1 }
 0x361   : > { %v1339_v28 = vadd.f32 -1.0, %v1115_v25 }
 0x363   : > { %v1124_v30 = vmul.f32 %v1339_v28, %v1119_v10 }
 0x365   : > { %v1125_v32 = vmul.f32 %v1322_v48, %v1124_v30 }
 0x367   : > { %v1126_v34 = vadd.f32 %v1125_v32, %v970_v19 }
 0x369   : > { %v1127_v36 = vmul.f32 8.0, %v1126_v34 }
 0x36b   : > { %v1159_v37 = vsel %vm360_vm0, %v1127_v36, -inf  ;;  %v1171_v52 = vmul.f32 %v1621_v31, %v1127_v36 }
 0x36c   : > { %1160 = vmax.xlane.f32.xlu0 %v1159_v37 }
 0x36d   : > { %v1172_v54 = vsel %vm360_vm0, %v1171_v52, 0.0 }
 0x3e9   : > { %v1130_v39 = vpop.xlane.xlu0 %1129 }
 0x3ea   : > { %v1131_v40 = vsub.f32 %v1123_v22, %v1130_v39 }
 0x3ec   : > { %v1132_v41 = vmul.f32 1.442695, %v1131_v40 }
 0x3ee   : > { %1511 = vpow2.f32 %v1132_v41 }
 0x3f8   : > { %v1512_v42 = vpop.eup %1511 }
 0x3f9   : > { %v1161_v43 = vpop.xlane.xlu0 %1160  ;;  %v1134_v44 = vsel %vm360_vm0, %v1512_v42, 0.0 }
 0x3fa   : > { %v1162_v45 = vsub.f32 %v1127_v36, %v1161_v43  ;;  %1135 = vadd.xlane.f32.xlu0 %v1134_v44 }
 0x3fc   : > { %v1163_v49 = vmul.f32 1.442695, %v1162_v45 }
 0x3fe   : > { %1513 = vpow2.f32 %v1163_v49 }
 0x408   : > { %v1514_v46 = vpop.eup %1513 }
 0x409   : > { %v1165_v3 = vsel %vm360_vm0, %v1514_v46, 0.0 }
 0x40a   : > { %1166 = vadd.xlane.f32.xlu0 %v1165_v3 }
 0x40e   : > { %1142 = vadd.xlane.f32.xlu0 %v1141_v50 }
 0x412   : > { %1173 = vadd.xlane.f32.xlu0 %v1172_v54 }
 0x487   : > { %v1136_v55 = vpop.xlane.xlu0 %1135 }
 0x488   : > { %1515 = vlog2.f32 %v1136_v55 }
 0x492   : > { %v1516_v57 = vpop.eup %1515 }
 0x493   : > { %v1138_v58 = vmul.f32 0.6931472, %v1516_v57 }
 0x495   : > { %v1139_v61 = vadd.f32 %v1138_v58, %v1130_v39 }
 0x497   : > { %v1167_v60 = vpop.xlane.xlu0 %1166 }
 0x498   : > { %1517 = vlog2.f32 %v1167_v60 }
 0x49b   : > { %v1143_v62 = vpop.xlane.xlu0 %1142 }
 0x49c   : > { %v1144_v63 = vsub.f32 %v1139_v61, %v1143_v62 }
 0x49e   : > { %v1146_v0 = vsel %vm1145_vm10, %v1144_v63, 0.0 }
 0x49f   : > { %1147 = vadd.xlane.f32.xlu0 %v1146_v0  ;;  %v1174_v31 = vpop.xlane.xlu0 %1173 }
 0x4a2   : > { %v1518_v1 = vpop.eup %1517 }
 0x4a3   : > { %v1169_v4 = vmul.f32 0.6931472, %v1518_v1 }
 0x4a5   : > { %v1170_v7 = vadd.f32 %v1169_v4, %v1161_v43 }
 0x4a7   : > { %v1175_v35 = vsub.f32 %v1170_v7, %v1174_v31 }
 0x4a9   : > { %v1176_v9 = vsel %vm1145_vm10, %v1175_v35, 0.0 }
 0x4aa   : > { %1177 = vadd.xlane.f32.xlu0 %v1176_v9 }
 0x52c   : > { %v1148_v29 = vpop.xlane.xlu0 %1147 }
 0x52d   : > { %v1149_v11 = vrot.slane %v1148_v29, 4 }
 0x52f   : > { %v1150_v8 = vadd.f32 %v1149_v11, %v1148_v29 }
 0x531   : > { %v1151_v6 = vrot.slane %v1150_v8, 2 }
 0x533   : > { %v1152_v12 = vadd.f32 %v1151_v6, %v1150_v8 }
 0x535   : > { %v1153_v13 = vrot.slane %v1152_v12, 1 }
 0x537   : > { %v1178_v14 = vpop.xlane.xlu0 %1177  ;;  %v1154_v15 = vadd.f32 %v1153_v13, %v1152_v12 }
 0x538   : > { %v1179_v33 = vrot.slane %v1178_v14, 4 }
 0x539   : > { %1474 = vpush %v1154_v15 }
 0x53a   : > { %v1180_v23 = vadd.f32 %v1179_v33, %v1178_v14 }
 0x53c   : > { %v1181_v38 = vrot.slane %v1180_v23, 2 }
 0x53e   : > { %v1182_v51 = vadd.f32 %v1181_v38, %v1180_v23 }
 0x540   : > { %v1183_v53 = vrot.slane %v1182_v51, 1 }
 0x542   : > { %v1184_v56 = vadd.f32 %v1183_v53, %v1182_v51 }
 0x544   : > { %1476 = vpush %v1184_v56 }
 0x56a   : > { %s1475_s26 = spop %1474 }
 0x56b   : > { %s1158_s27 = smul.f32 0.125, %s1475_s26 }
 0x575   : > { %s1477_s28 = spop %1476 }
 0x576   : > { %s1188_s29 = smul.f32 0.125, %s1477_s28 }
 0x578   : > { %s1189_s10 = sadd.f32 %s1188_s29, %s1158_s27 }
 0x57a   : > { %v1190_v59 = vstv %s1189_s10 }
 0x57b   : > { %1191 = vst [vmem:[%s333_s9] sm:$0x1] %v1190_v59 }
 0x57c PF: > { %s18_s24 = sadd.s32 1, %s1525_s24  }
 0x57d   : > { %p15_p4 = scmp.ge.s32.totalorder %s18_s24, 4  }
 0x57f   :  { %17 = sbr.rel (!%p15_p4) target bundleno = 1 (0x1), region = 95 }

</bundles_post_ra>
